<compile_context>
chip_gen: v7x
topology: tpu7x:2x2x1
jax: 0.10.0
libtpu: 0.0.40
codegen_flags: <defaults>
</compile_context>

<pallas_src>
import numpy as np
import jax
import jax.numpy as jnp
from jax.experimental import pallas as pl
from jax.experimental.pallas import tpu as pltpu

# ---------------- module hyper-parameters (from __init__) ----------------
TEMPERATURE = 0.01
N_ENS = 5          # N
D1 = 3
D2 = 2
D = D1 * D2        # 6
BW = 3             # maxBWPow
NUM_POSSIBLE_PARTITIONS = 5
RES_DENOS = np.array([2**2 - 1, 2**2 + 1, 2**4 + 1, 2**8 + 1, 2**16 + 1],
                     dtype=np.float32)


# ---------------- host-side weight quantization (numpy) ----------------
def _stable_sigmoid(x):
    x = np.asarray(x, dtype=np.float32)
    out = np.empty_like(x)
    pos = x >= 0
    out[pos] = 1.0 / (1.0 + np.exp(-x[pos]))
    ex = np.exp(x[~pos])
    out[~pos] = ex / (1.0 + ex)
    return out.astype(np.float32)


def _unique_columns(a):
    """torch.unique(a, dim=1, return_inverse, return_counts) equivalent."""
    cols = [tuple(float(v) for v in a[:, j]) for j in range(a.shape[1])]
    uniq = sorted(set(cols))
    mapping = {c: i for i, c in enumerate(uniq)}
    values = np.array(uniq, dtype=a.dtype).T            # (rows, n_unique)
    inverse = np.array([mapping[c] for c in cols], dtype=np.int64)
    counts = np.bincount(inverse, minlength=len(uniq)).astype(np.int64)
    return values, inverse, counts


def quantize_weights(U, thres_mean, d1=D1, d2=D2, bw=BW,
                     npp=NUM_POSSIBLE_PARTITIONS):
    """Faithful numpy port of the forward's residual bit-tree quantization.
    Note: module's custom `round` forwards torch.floor.
    np.repeat(thres_mean, d1) matches torch's repeat_interleave semantics
    ([t0,t0,t0,t1,t1,t1]) used by the reference."""
    U = np.asarray(U, dtype=np.float32)
    Nn, Dd = U.shape
    beta = np.float32(U.max())
    alpha = np.float32(U.min())
    s = None
    vals = []
    for idx in range(bw):
        deno = RES_DENOS[idx]
        if s is None:
            s = np.float32((beta - alpha) / deno)
            vals.append((s * np.floor(U / s)).astype(np.float32))
            continue

        s = np.float32(s / deno)
        res_err = (U - np.sum(vals, axis=0)).astype(np.float32)       # (N, D)

        # sort residual errors per column (ascending) -- update_partition branch
        idx_maps = np.argsort(res_err, axis=0, kind="stable")          # (N, D)
        sorted_err = np.take_along_axis(res_err, idx_maps, axis=0)
        transfer = np.zeros((Nn, Dd, Nn), dtype=np.float32)            # one_hot
        transfer[np.arange(Nn)[:, None], np.arange(Dd)[None, :], idx_maps] = 1.0

        delta = sorted_err[1:, :] - sorted_err[:-1, :]                 # (N-1, D)
        dmax = np.float32(delta.max())
        # Guard degenerate case (all residuals identical) that would produce
        # NaN/Inf in the reference; semantics unchanged on non-degenerate data.
        delta = delta / (dmax if dmax != 0.0 else np.float32(1.0))
        thr = _stable_sigmoid(np.repeat(thres_mean.astype(np.float32), d1))
        msp = _stable_sigmoid((delta - thr[None, :]) / np.float32(0.01))
        round_split = np.round(msp).astype(np.float32)

        values, inverse, counts = _unique_columns(round_split)
        s_indices = np.argsort(-counts, kind="stable")
        top = s_indices[:npp]
        clustered = inverse.copy()
        for s_idx_less in s_indices[npp:]:
            inter = values[:, s_idx_less:s_idx_less + 1] * values[:, top]
            selected = int(np.argmax(inter.sum(axis=0)))
            clustered[clustered == s_idx_less] = top[selected]

        pieces, inner_cols = [], []
        for s_idx in top:
            cols = np.nonzero(clustered == s_idx)[0]
            if cols.size == 0:
                continue
            inner_cols.append(cols)
            piece = sorted_err[:, cols]                                # (N, k)
            split_scheme = round_split[:, s_idx]                       # (N-1,)
            buf = np.zeros(cols.size, dtype=np.float32)
            local_cnt = 0
            grad_ = np.float32(1.0)
            t_l = []
            for iidx in range(Nn):
                buf = buf + piece[iidx]
                local_cnt += 1
                if iidx == Nn - 1:
                    row = grad_ * (buf / local_cnt)
                    t_l.append(np.broadcast_to(row[None, :],
                                               (local_cnt, cols.size)).copy())
                elif np.round(split_scheme[iidx]) != 0:
                    grad_ = grad_ * msp[iidx, s_idx]
                    row = grad_ * (buf / local_cnt)
                    t_l.append(np.broadcast_to(row[None, :],
                                               (local_cnt, cols.size)).copy())
                    buf = np.zeros(cols.size, dtype=np.float32)
                    local_cnt = 0
                    grad_ = np.float32(1.0)
                else:
                    grad_ = grad_ * (np.float32(1.0) - msp[iidx, s_idx])
            pieces.append(np.concatenate(t_l, axis=0))

        inner_idxs = np.concatenate(inner_cols)                        # (D,)
        inner_transfer_x = np.zeros(Dd, dtype=np.int64)
        inner_transfer_x[inner_idxs] = np.arange(Dd)
        all_pieces = np.concatenate(pieces, axis=1)                    # (N, D)
        inner_grouped = all_pieces[:, inner_transfer_x]
        grouped = np.einsum("cb,cba->ab", inner_grouped,
                            transfer).astype(np.float32)
        quantized = (s * np.floor(grouped / s)).astype(np.float32)
        vals.append(quantized)

    w = np.sum(vals, axis=0).reshape(Nn, d1, d2).astype(np.float32)
    return w


# ---------------- host-side constant packing (done ONCE) ----------------
def block_diag_weight_t(w_np):
    """(N, D1, D2) -> transposed block-diagonal weight (N*D2, N*D1), packed
    once on the host after quantization (w is frozen); no per-call packing."""
    n, d1, d2 = w_np.shape
    w_bd = np.zeros((n * d1, n * d2), dtype=np.float32)
    for i in range(n):
        w_bd[i * d1:(i + 1) * d1, i * d2:(i + 1) * d2] = w_np[i]
    # TODO(synk): block-diag packing is O(N^2); if N_ENS grows beyond ~8-16,
    # switch to a grid axis over N with per-ensemble (D1, D2) tiles instead.
    return np.ascontiguousarray(w_bd.T)


# ---------------- Pallas kernel: batched ensemble contraction ----------------
def _baens_matmul_kernel(xT_ref, wT_ref, oT_ref):
    # xT_ref: (N*D1, TB)  lane-dense (batch on lanes)
    # wT_ref: (N*D2, N*D1) tiny, resident across grid steps
    # oT_ref: (N*D2, TB)  lane-dense output -> unmasked vst
    oT_ref[...] = jnp.dot(
        wT_ref[...], xT_ref[...],
        preferred_element_type=jnp.float32).astype(oT_ref.dtype)


def ensemble_matmul(x, w_bd_t, *, lane_tile=2048):
    """act = einsum('bnd,ndl->bnl', x, w) as a pipelined lane-dense Pallas
    matmul against the host-precomputed block-diagonal transposed weight.

    x: (B, N, D1) float32;  w_bd_t: (N*D2, N*D1) float32 (frozen constant).
    Returns (B, N, D2).
    """
    bsz, nens, din = x.shape
    m, k = w_bd_t.shape                       # (N*D2, N*D1)
    assert k == nens * din
    dout = m // nens

    # Feature-major view: batch becomes the 128-lane axis.  reshape is free;
    # the transpose is one XLA layout op (layout plumbing, not compute).
    xT = x.reshape(bsz, k).T                  # (K, B)

    if bsz <= lane_tile:
        tb = bsz                              # single step; full-dim block, so
        bp = bsz                              # no (8,128) divisibility rule
    else:
        tb = lane_tile                        # multiple of 128 -> lane aligned
        bp = pl.cdiv(bsz, tb) * tb
        if bp != bsz:                         # pad so tiles cover B exactly
            xT = jnp.pad(xT, ((0, 0), (0, bp - bsz)))

    grid = (bp // tb,)

    oT = pl.pallas_call(
        _baens_matmul_kernel,
        out_shape=jax.ShapeDtypeStruct((m, bp), x.dtype),
        grid=grid,
        in_specs=[
            pl.BlockSpec((k, tb), lambda i: (0, i)),   # x tile (lane-dense)
            pl.BlockSpec((m, k), lambda i: (0, 0)),    # weight (resident)
        ],
        out_specs=pl.BlockSpec((m, tb), lambda i: (0, i)),
        compiler_params=pltpu.CompilerParams(
            dimension_semantics=("parallel",)),        # 2-TC sharding on v7x
        cost_estimate=pl.CostEstimate(
            flops=2 * m * k * bp,
            transcendentals=0,
            bytes_accessed=4 * (k * bp + m * bp + m * k)),
    )(xT, w_bd_t)

    if bp != bsz:
        oT = oT[:, :bsz]
    return oT.T.reshape(bsz, nens, dout)      # back to batch-major interface


# ---------------- driver ----------------
if __name__ == "__main__":
    key = jax.random.PRNGKey(0)
    k_u, k_x, k_x2 = jax.random.split(key, 3)

    # Parameters (deterministic synthetic init):
    #   U ~ kaiming_normal for a (N, D) tensor: std = sqrt(2 / fan_in), fan_in = D
    U = (np.asarray(jax.random.normal(k_u, (N_ENS, D), dtype=jnp.float32))
         * np.sqrt(2.0 / D)).astype(np.float32)
    thres_mean = np.full((D2,), -1.3, dtype=np.float32)

    # Host-side residual bit-tree quantization of U -> w: (N, D1, D2),
    # then one-time block-diagonal packing of the frozen weight.
    w_np = quantize_weights(U, thres_mean)
    w = jnp.asarray(w_np, dtype=jnp.float32)
    w_bd_t = jnp.asarray(block_diag_weight_t(w_np))     # (N*D2, N*D1)

    # Module-scale input x: (B, N, D1)  -- einsum('bnd,ndl->bnl')
    B = 4
    x = jax.random.normal(k_x, (B, N_ENS, D1), dtype=jnp.float32)

    act = jax.block_until_ready(ensemble_matmul(x, w_bd_t))

    # nan check (mirrors the module's runtime check)
    assert not bool(jnp.any(jnp.isnan(act)))

    # correctness check against plain-JAX reference of the hot path
    ref = jnp.einsum("bnd,ndl->bnl", x, w)
    assert act.shape == (B, N_ENS, D2)
    assert bool(jnp.allclose(act, ref, atol=1e-5, rtol=1e-5))

    # Exercise the pipelined multi-step grid (divisible and padded-edge paths)
    # with a small lane tile so the test stays tiny.
    for b2, tile in ((512, 128), (500, 128)):
        x2 = jax.random.normal(k_x2, (b2, N_ENS, D1), dtype=jnp.float32)
        act2 = jax.block_until_ready(ensemble_matmul(x2, w_bd_t, lane_tile=tile))
        ref2 = jnp.einsum("bnd,ndl->bnl", x2, w)
        assert bool(jnp.allclose(act2, ref2, atol=1e-5, rtol=1e-5))

    print("KERNEL_OK")
</pallas_src>

<mosaic_0001>
module attributes {stable_mosaic.version = 11 : i64} {
  func.func @_baens_matmul_kernel(%arg0: i32, %arg1: memref<15x4xf32, #tpu.memory_space<vmem>>, %arg2: memref<10x15xf32, #tpu.memory_space<vmem>>, %arg3: memref<10x4xf32, #tpu.memory_space<vmem>>) attributes {dimension_semantics = [#tpu.dimension_semantics<parallel>], iteration_bounds = array<i64: 1>, scalar_prefetch = 0 : i64, scratch_operands = 0 : i64, tpu.core_type = #tpu.core_type<tc>, window_params = [{transform_indices = @transform_0, window_bounds = array<i64: 15, 4>}, {pipeline_mode = #tpu.pipeline_mode<synchronous>, transform_indices = @transform_1, window_bounds = array<i64: 10, 15>}, {transform_indices = @transform_2, window_bounds = array<i64: 10, 4>}]} {
    %c0 = arith.constant 0 : index
    %c0_0 = arith.constant 0 : index
    %0 = vector.load %arg2[%c0, %c0_0] : memref<10x15xf32, #tpu.memory_space<vmem>>, vector<10x15xf32>
    %c0_1 = arith.constant 0 : index
    %c0_2 = arith.constant 0 : index
    %1 = vector.load %arg1[%c0_1, %c0_2] : memref<15x4xf32, #tpu.memory_space<vmem>>, vector<15x4xf32>
    %cst = arith.constant dense<0.000000e+00> : vector<10x4xf32>
    %2 = tpu.matmul %0, %1, %cst {dimension_numbers = #tpu.dot_dimension_numbers<[1], [0], [0], [1], [0, 0, 1, 1], [], []>} : vector<10x15xf32>, vector<15x4xf32>, vector<10x4xf32> -> vector<10x4xf32>
    %c0_3 = arith.constant 0 : index
    %c0_4 = arith.constant 0 : index
    %3 = vector.load %arg3[%c0_3, %c0_4] : memref<10x4xf32, #tpu.memory_space<vmem>>, vector<10x4xf32>
    tpu.vector_store %arg3[%c0_3, %c0_4], %2 {strides = array<i32>} : memref<10x4xf32, #tpu.memory_space<vmem>>, vector<10x4xf32>,
    return
  }
  func.func @transform_0(%arg0: i32) -> (i32, i32) {
    %c0_i32 = arith.constant 0 : i32
    %c0_i32_0 = arith.constant 0 : i32
    return %c0_i32, %arg0 : i32, i32
  }
  func.func @transform_1(%arg0: i32) -> (i32, i32) {
    %c0_i32 = arith.constant 0 : i32
    %c0_i32_0 = arith.constant 0 : i32
    %c0_i32_1 = arith.constant 0 : i32
    return %c0_i32, %c0_i32_0 : i32, i32
  }
  func.func @transform_2(%arg0: i32) -> (i32, i32) {
    %c0_i32 = arith.constant 0 : i32
    %c0_i32_0 = arith.constant 0 : i32
    return %c0_i32, %arg0 : i32, i32
  }
}

</mosaic_0001>

<bundles_post_ra>
// kernel: tpu_custom_call.1
= control target key start
LH: loop header
LB: loop body
LE: loop exit
PB: predicated region body
PF: predicated region fallthrough
CT: control target
= control target key end

     0   :  { %vm22_vm0 = vcmask 1046528   ;;  %vm15_vm1 = vcmask 121856   ;;  %vm130_vm2 = vmmov 1   ;;  %vm103_vm4 = vcmask 25600   ;;  %s164_s0 = inlined_call_operand.vmem [shape: f32[15,4], index: 0, kind: input, shape index: {}]   ;;  %s165_s1 = inlined_call_operand.vmem [shape: f32[10,15], index: 1, kind: input, shape index: {}]   ;;  %s166_s2 = inlined_call_operand.vmem [shape: f32[10,4], index: 2, kind: output, shape index: {}]  }
   0x1   :  { %v13_v0 = vld [vmem:[%s164_s0] sm:$0xff]  ;;  %v14_v1 = vld [vmem:[%s164_s0 + $0x8] sm:$0x7f]  ;;  %vm124_vm3 = vmpackc.low %vm22_vm0, %vm130_vm2  ;;  %vm101_vm5 = vcmask 31744  }
   0x2   :  { %v123_v2 = vpack.c.bf16 %v14_v1, %v13_v0  ;;  %v11_v3 = vld [vmem:[%s165_s1] sm:$0xff]  ;;  %v12_v4 = vld [vmem:[%s165_s1 + $0x8] sm:$0x3] }
   0x3   :  { %120 = vmatprep.mubr.msk.f32.mxu0 %vm15_vm1, %v11_v3 }
   0x4   :  { %125 = vmatprep.subr.msk.bf16.mxu0 %vm124_vm3, %v123_v2 }
   0x5   :  { %128 = vmatpush3.bf16.msk.msra.mxu0 %vm124_vm3, %v123_v2 }
   0x8   :  { %121 = vmatmul.mubr.msk.f32.vlgmr.msra.gmra.mrb[0].mxu0 %vm15_vm1, %v12_v4 }
  0xdb   :  { %v122_v5 = vpop.f32.mrb[0].mxu0 }
  0xdc   :  { %104 = vst.msk [vmem:[%s166_s2 + $0x8] sm:$0x3] %vm103_vm4, %v122_v5  ;;  %v92_v6 = vpop.f32.mrb[1].mxu0 }
  0xdd   :  { %102 = vst.msk [vmem:[%s166_s2] sm:$0xff] %vm101_vm5, %v92_v6 }

</bundles_post_ra>
